<compile_context>
chip_gen: v6e
topology: v6e:2x2x1
jax: 0.10.0
libtpu: 0.0.40
codegen_flags: <defaults>
</compile_context>

<pallas_src>
import functools
import math

import jax
import jax.numpy as jnp
from jax.experimental import pallas as pl
from jax.experimental.pallas import tpu as pltpu

LN_EPS = 1e-5
_NEG_BIG = -1e30  # finite "-inf" so masked rows never produce NaN


def _round_up(n, m):
    return ((n + m - 1) // m) * m


def _vmem_limit_bytes():
    cap = 64 * 1024 * 1024  # conservative fallback (fits v7x's 64 MiB)
    try:
        cap = int(pltpu.get_tpu_info().vmem_capacity_bytes)
    except Exception:
        pass
    return int(min(cap * 3 // 4, 96 * 1024 * 1024))


# -----------------------------------------------------------------------------
# Kernel 1: LayerNorm + fused QKV projection (runs exactly once per token).
# -----------------------------------------------------------------------------
def _ln_qkv_kernel(x_ref, gamma_ref, beta_ref, wqkv_ref, q_ref, k_ref, v_ref,
                   *, heads, dim_head):
    inner = heads * dim_head
    x = x_ref[0].astype(jnp.float32)                            # (T, D)
    mu = jnp.mean(x, axis=-1, keepdims=True)
    var = jnp.mean(jnp.square(x - mu), axis=-1, keepdims=True)
    xn = (x - mu) * jax.lax.rsqrt(var + LN_EPS) * gamma_ref[0] + beta_ref[0]
    # One lane-dense matmul; softmax scale is pre-folded into the Q columns
    # of wqkv in the wrapper.  bf16 operands, f32 accumulation on the MXU.
    qkv = jnp.dot(xn.astype(jnp.bfloat16), wqkv_ref[...],
                  preferred_element_type=jnp.float32)           # (T, 3*inner)
    qkv = qkv.astype(jnp.bfloat16)
    # Scatter once into head-major (H, T, Dh) layout for the attention kernel.
    for h in range(heads):
        lo = h * dim_head
        q_ref[0, h] = qkv[:, 0 * inner + lo:0 * inner + lo + dim_head]
        k_ref[0, h] = qkv[:, 1 * inner + lo:1 * inner + lo + dim_head]
        v_ref[0, h] = qkv[:, 2 * inner + lo:2 * inner + lo + dim_head]


# -----------------------------------------------------------------------------
# Kernel 2: flash attention (online softmax) + head merge + output projection.
# -----------------------------------------------------------------------------
def _flash_attn_kernel(q_ref, k_ref, v_ref, wo_ref, bo_ref, o_ref,
                       m_ref, l_ref, acc_ref, *, kv_tile, n_valid, need_mask):
    kv_idx = pl.program_id(2)

    # ---- per-(batch, q-tile) init of online-softmax state -------------------
    @pl.when(kv_idx == 0)
    def _():
        m_ref[...] = jnp.full_like(m_ref, -jnp.inf)
        l_ref[...] = jnp.zeros_like(l_ref)
        acc_ref[...] = jnp.zeros_like(acc_ref)

    q = q_ref[0]                                                # (H, TQ, Dh) bf16
    k = k_ref[0]                                                # (H, TK, Dh) bf16
    v = v_ref[0]                                                # (H, TK, Dh) bf16

    s = jnp.einsum('hqd,hkd->hqk', q, k,
                   preferred_element_type=jnp.float32)          # (H, TQ, TK) f32

    if need_mask:  # static: only emitted when N was padded
        col = kv_idx * kv_tile + jax.lax.broadcasted_iota(
            jnp.int32, (1, 1, kv_tile), 2)
        s = jnp.where(col < n_valid, s, _NEG_BIG)

    m_prev = m_ref[...]
    m_new = jnp.maximum(m_prev, jnp.max(s, axis=-1, keepdims=True))
    alpha = jnp.exp(m_prev - m_new)
    # TODO(synk): on v6e/v7x a bf16 exp would double EUP throughput; kept f32
    # for v5e portability (no bf16 EUP) and accuracy.
    p = jnp.exp(s - m_new)
    l_ref[...] = alpha * l_ref[...] + jnp.sum(p, axis=-1, keepdims=True)
    acc_ref[...] = alpha * acc_ref[...] + jnp.einsum(
        'hqk,hkd->hqd', p.astype(jnp.bfloat16), v,
        preferred_element_type=jnp.float32)
    m_ref[...] = m_new
    # TODO(synk): dropout omitted (module default p=0.0 => identity).

    # ---- epilogue: normalize, merge heads, output projection ----------------
    @pl.when(kv_idx == pl.num_programs(2) - 1)
    def _():
        inv_l = pl.reciprocal(l_ref[...], approx=True)          # EUP slot
        out = (acc_ref[...] * inv_l).astype(jnp.bfloat16)       # (H, TQ, Dh)
        y = jnp.einsum('hqd,hdo->qo', out, wo_ref[...],
                       preferred_element_type=jnp.float32)      # (TQ, D)
        o_ref[0] = (y + bo_ref[0]).astype(o_ref.dtype)


def attention_forward(x, params, heads, dim_head, *, q_tile=256, kv_tile=512):
    """x: (B, N, D) float32.  params: dict of weights (see init_params)."""
    B, N, D = x.shape
    H, Dh = heads, dim_head
    inner = H * Dh
    scale = dim_head ** (-0.5)

    # ---- tile / padding selection (pad + mask, no whole-N fallback) --------
    n8 = _round_up(N, 8)
    if n8 <= q_tile:
        TQ = TK = n8
    else:
        TQ = q_tile
        TK = min(kv_tile, _round_up(n8, TQ))
    n_pad = _round_up(N, math.lcm(TQ, TK))
    need_mask = n_pad != N
    x_in = x if not need_mask else jnp.pad(x, ((0, 0), (0, n_pad - N), (0, 0)))

    # ---- parameter prep ------------------------------------------------------
    gamma = params['ln_gamma'].reshape(1, D).astype(jnp.float32)
    beta = params['ln_beta'].reshape(1, D).astype(jnp.float32)

    # to_qkv.weight: (3*inner, D) -> (D, 3*inner); fold softmax scale into Q.
    w_t = params['w_qkv'].T.astype(jnp.float32)
    w_t = jnp.concatenate([w_t[:, :inner] * scale, w_t[:, inner:]], axis=1)
    wqkv = w_t.astype(jnp.bfloat16)                              # (D, 3*inner)

    # to_out[0].weight: (D, inner) -> (inner, D) -> (H, Dh, D)
    # NOTE: module's project_out=Identity branch (heads==1 and dim_head==dim)
    # is not taken for these configs; projection weights are always applied.
    wo = params['w_out'].T.reshape(H, Dh, D).astype(jnp.bfloat16)
    bo = params['b_out'].reshape(1, D).astype(jnp.float32)

    vmem_resident = pl.BlockSpec(memory_space=pltpu.MemorySpace.VMEM)
    vmem_limit = _vmem_limit_bytes()

    # ---- kernel 1: LN + QKV projection --------------------------------------
    qkv_shape = jax.ShapeDtypeStruct((B, H, n_pad, Dh), jnp.bfloat16)
    proj_cost = pl.CostEstimate(
        flops=2 * B * n_pad * D * 3 * inner,
        transcendentals=B * n_pad,
        bytes_accessed=B * n_pad * D * 4 + 3 * B * n_pad * inner * 2
        + D * 3 * inner * 2)

    q, k, v = pl.pallas_call(
        functools.partial(_ln_qkv_kernel, heads=H, dim_head=Dh),
        out_shape=(qkv_shape, qkv_shape, qkv_shape),
        grid_spec=pltpu.PrefetchScalarGridSpec(
            num_scalar_prefetch=0,
            grid=(B, n_pad // TQ),
            in_specs=[
                pl.BlockSpec((1, TQ, D), lambda b, r: (b, r, 0)),  # x rows
                vmem_resident,   # gamma (1, D) f32
                vmem_resident,   # beta  (1, D) f32
                vmem_resident,   # wqkv  (D, 3*inner) bf16 (Q-scale folded)
            ],
            out_specs=[
                pl.BlockSpec((1, H, TQ, Dh), lambda b, r: (b, 0, r, 0)),
                pl.BlockSpec((1, H, TQ, Dh), lambda b, r: (b, 0, r, 0)),
                pl.BlockSpec((1, H, TQ, Dh), lambda b, r: (b, 0, r, 0)),
            ],
        ),
        compiler_params=pltpu.CompilerParams(
            dimension_semantics=("parallel", "parallel"),
            vmem_limit_bytes=vmem_limit),
        cost_estimate=proj_cost,
    )(x_in, gamma, beta, wqkv)

    # ---- kernel 2: flash attention + output projection ----------------------
    attn_cost = pl.CostEstimate(
        flops=4 * B * H * n_pad * n_pad * Dh + 2 * B * n_pad * inner * D,
        transcendentals=B * H * n_pad * n_pad,
        bytes_accessed=3 * B * H * n_pad * Dh * 2 + B * n_pad * D * 4
        + inner * D * 2)

    out = pl.pallas_call(
        functools.partial(_flash_attn_kernel, kv_tile=TK, n_valid=N,
                          need_mask=need_mask),
        out_shape=jax.ShapeDtypeStruct((B, n_pad, D), x.dtype),
        grid_spec=pltpu.PrefetchScalarGridSpec(
            num_scalar_prefetch=0,
            grid=(B, n_pad // TQ, n_pad // TK),
            in_specs=[
                pl.BlockSpec((1, H, TQ, Dh), lambda b, qi, ki: (b, 0, qi, 0)),
                pl.BlockSpec((1, H, TK, Dh), lambda b, qi, ki: (b, 0, ki, 0)),
                pl.BlockSpec((1, H, TK, Dh), lambda b, qi, ki: (b, 0, ki, 0)),
                vmem_resident,   # wo (H, Dh, D) bf16
                vmem_resident,   # bo (1, D)     f32
            ],
            out_specs=pl.BlockSpec((1, TQ, D), lambda b, qi, ki: (b, qi, 0)),
            scratch_shapes=[
                pltpu.VMEM((H, TQ, 1), jnp.float32),    # running max
                pltpu.VMEM((H, TQ, 1), jnp.float32),    # running sum
                pltpu.VMEM((H, TQ, Dh), jnp.float32),   # output accumulator
            ],
        ),
        compiler_params=pltpu.CompilerParams(
            dimension_semantics=("parallel", "parallel", "arbitrary"),
            vmem_limit_bytes=vmem_limit),
        cost_estimate=attn_cost,
    )(q, k, v, wo, bo)

    return out if not need_mask else out[:, :N, :]


def init_params(key, dim, heads, dim_head):
    inner = heads * dim_head
    k1, k2, k3 = jax.random.split(key, 3)
    return {
        'ln_gamma': jnp.ones((dim,), jnp.float32),
        'ln_beta': jnp.zeros((dim,), jnp.float32),
        'w_qkv': jax.random.normal(k1, (3 * inner, dim), jnp.float32) * 0.05,
        'w_out': jax.random.normal(k2, (dim, inner), jnp.float32) * 0.05,
        'b_out': jax.random.normal(k3, (dim,), jnp.float32) * 0.05,
    }


def reference_forward(x, params, heads, dim_head):
    """Pure-JAX f32 reference replicating the PyTorch semantics."""
    B, N, D = x.shape
    H, Dh = heads, dim_head
    inner = H * Dh
    scale = dim_head ** (-0.5)

    mean = jnp.mean(x, axis=-1, keepdims=True)
    var = jnp.mean((x - mean) ** 2, axis=-1, keepdims=True)
    xn = (x - mean) / jnp.sqrt(var + LN_EPS)
    xn = xn * params['ln_gamma'] + params['ln_beta']

    qkv = xn @ params['w_qkv'].T                          # (B, N, 3*inner)
    q, k, v = jnp.split(qkv, 3, axis=-1)

    def to_heads(t):  # 'b n (h d) -> b h n d'
        return t.reshape(B, N, H, Dh).transpose(0, 2, 1, 3)

    q, k, v = map(to_heads, (q, k, v))
    dots = jnp.einsum('bhnd,bhmd->bhnm', q, k) * scale
    attn = jax.nn.softmax(dots, axis=-1)
    out = jnp.einsum('bhnm,bhmd->bhnd', attn, v)
    out = out.transpose(0, 2, 1, 3).reshape(B, N, inner)  # 'b h n d -> b n (h d)'
    return out @ params['w_out'].T + params['b_out']


if __name__ == "__main__":
    B, N, D = 2, 8, 32
    heads, dim_head = 4, 16

    key = jax.random.PRNGKey(0)
    kx, kp = jax.random.split(key)
    x = jax.random.normal(kx, (B, N, D), jnp.float32)
    params = init_params(kp, D, heads, dim_head)

    y = attention_forward(x, params, heads, dim_head)
    y = jax.block_until_ready(y)

    y_ref = reference_forward(x, params, heads, dim_head)
    assert y.shape == (B, N, D)
    max_err = jnp.max(jnp.abs(y - y_ref))
    # bf16 MXU operands (f32 accumulation) vs the all-f32 reference.
    assert jnp.allclose(y, y_ref, atol=5e-2, rtol=5e-2), f"max abs err {max_err}"

    print("KERNEL_OK")
</pallas_src>

<mosaic_0001>
module attributes {stable_mosaic.version = 11 : i64} {
  func.func @_ln_qkv_kernel(%arg0: i32, %arg1: i32, %arg2: memref<1x8x32xf32, #tpu.memory_space<vmem>>, %arg3: memref<1x32xf32, #tpu.memory_space<vmem>>, %arg4: memref<1x32xf32, #tpu.memory_space<vmem>>, %arg5: memref<32x192xbf16, #tpu.memory_space<vmem>>, %arg6: memref<1x4x8x16xbf16, #tpu.memory_space<vmem>>, %arg7: memref<1x4x8x16xbf16, #tpu.memory_space<vmem>>, %arg8: memref<1x4x8x16xbf16, #tpu.memory_space<vmem>>) attributes {dimension_semantics = [#tpu.dimension_semantics<parallel>, #tpu.dimension_semantics<parallel>], iteration_bounds = array<i64: 2, 1>, scalar_prefetch = 0 : i64, scratch_operands = 0 : i64, tpu.core_type = #tpu.core_type<tc>, window_params = [{transform_indices = @transform_0, window_bounds = array<i64: 1, 8, 32>}, {pipeline_mode = #tpu.pipeline_mode<synchronous>, transform_indices = @transform_1, window_bounds = array<i64: 1, 32>}, {pipeline_mode = #tpu.pipeline_mode<synchronous>, transform_indices = @transform_2, window_bounds = array<i64: 1, 32>}, {pipeline_mode = #tpu.pipeline_mode<synchronous>, transform_indices = @transform_3, window_bounds = array<i64: 32, 192>}, {transform_indices = @transform_4, window_bounds = array<i64: 1, 4, 8, 16>}, {transform_indices = @transform_5, window_bounds = array<i64: 1, 4, 8, 16>}, {transform_indices = @transform_6, window_bounds = array<i64: 1, 4, 8, 16>}]} {
    %c0 = arith.constant 0 : index
    %c0_0 = arith.constant 0 : index
    %c0_1 = arith.constant 0 : index
    %0 = vector.load %arg2[%c0, %c0_0, %c0_1] : memref<1x8x32xf32, #tpu.memory_space<vmem>>, vector<1x8x32xf32>
    %1 = vector.shape_cast %0 : vector<1x8x32xf32> to vector<8x32xf32>
    %cst = arith.constant dense<0.000000e+00> : vector<8xf32>
    %2 = vector.multi_reduction <add>, %1, %cst [1] : vector<8x32xf32> to vector<8xf32>
    %3 = vector.shape_cast %2 : vector<8xf32> to vector<8x1xf32>
    %cst_2 = arith.constant 3.200000e+01 : f32
    %4 = vector.broadcast %cst_2 : f32 to vector<8x1xf32>
    %5 = arith.divf %3, %4 : vector<8x1xf32>
    %6 = vector.broadcast %5 : vector<8x1xf32> to vector<8x32xf32>
    %7 = arith.subf %1, %6 : vector<8x32xf32>
    %8 = arith.mulf %7, %7 : vector<8x32xf32>
    %cst_3 = arith.constant dense<0.000000e+00> : vector<8xf32>
    %9 = vector.multi_reduction <add>, %8, %cst_3 [1] : vector<8x32xf32> to vector<8xf32>
    %10 = vector.shape_cast %9 : vector<8xf32> to vector<8x1xf32>
    %cst_4 = arith.constant 3.200000e+01 : f32
    %11 = vector.broadcast %cst_4 : f32 to vector<8x1xf32>
    %12 = arith.divf %10, %11 : vector<8x1xf32>
    %13 = vector.broadcast %5 : vector<8x1xf32> to vector<8x32xf32>
    %14 = arith.subf %1, %13 : vector<8x32xf32>
    %cst_5 = arith.constant 9.99999974E-6 : f32
    %15 = vector.broadcast %cst_5 : f32 to vector<8x1xf32>
    %16 = arith.addf %12, %15 : vector<8x1xf32>
    %17 = math.rsqrt %16 : vector<8x1xf32>
    %18 = vector.broadcast %17 : vector<8x1xf32> to vector<8x32xf32>
    %19 = arith.mulf %14, %18 : vector<8x32xf32>
    %c0_6 = arith.constant 0 : index
    %c0_7 = arith.constant 0 : index
    %20 = vector.load %arg3[%c0_6, %c0_7] : memref<1x32xf32, #tpu.memory_space<vmem>>, vector<1x32xf32>
    %21 = vector.shape_cast %20 : vector<1x32xf32> to vector<32xf32>
    %22 = vector.shape_cast %21 : vector<32xf32> to vector<1x32xf32>
    %23 = vector.broadcast %22 : vector<1x32xf32> to vector<8x32xf32>
    %24 = arith.mulf %19, %23 : vector<8x32xf32>
    %c0_8 = arith.constant 0 : index
    %c0_9 = arith.constant 0 : index
    %25 = vector.load %arg4[%c0_8, %c0_9] : memref<1x32xf32, #tpu.memory_space<vmem>>, vector<1x32xf32>
    %26 = vector.shape_cast %25 : vector<1x32xf32> to vector<32xf32>
    %27 = vector.shape_cast %26 : vector<32xf32> to vector<1x32xf32>
    %28 = vector.broadcast %27 : vector<1x32xf32> to vector<8x32xf32>
    %29 = arith.addf %24, %28 : vector<8x32xf32>
    %30 = arith.truncf %29 : vector<8x32xf32> to vector<8x32xbf16>
    %c0_10 = arith.constant 0 : index
    %c0_11 = arith.constant 0 : index
    %31 = vector.load %arg5[%c0_10, %c0_11] : memref<32x192xbf16, #tpu.memory_space<vmem>>, vector<32x192xbf16>
    %cst_12 = arith.constant dense<0.000000e+00> : vector<8x192xf32>
    %32 = tpu.matmul %30, %31, %cst_12 {dimension_numbers = #tpu.dot_dimension_numbers<[1], [0], [0], [1], [0, 0, 1, 1], [], []>} : vector<8x32xbf16>, vector<32x192xbf16>, vector<8x192xf32> -> vector<8x192xf32>
    %33 = arith.truncf %32 : vector<8x192xf32> to vector<8x192xbf16>
    %34 = vector.extract_strided_slice %33 {offsets = [0, 0], sizes = [8, 16], strides = [1, 1]} : vector<8x192xbf16> to vector<8x16xbf16>
    %c0_13 = arith.constant 0 : index
    %c0_14 = arith.constant 0 : index
    %c0_15 = arith.constant 0 : index
    %c0_16 = arith.constant 0 : index
    %35 = vector.load %arg6[%c0_13, %c0_14, %c0_15, %c0_16] : memref<1x4x8x16xbf16, #tpu.memory_space<vmem>>, vector<1x1x8x16xbf16>
    %36 = vector.shape_cast %35 : vector<1x1x8x16xbf16> to vector<8x16xbf16>
    %37 = vector.shape_cast %34 : vector<8x16xbf16> to vector<1x1x8x16xbf16>
    tpu.vector_store %arg6[%c0_13, %c0_14, %c0_15, %c0_16], %37 {strides = array<i32>} : memref<1x4x8x16xbf16, #tpu.memory_space<vmem>>, vector<1x1x8x16xbf16>,
    %38 = vector.extract_strided_slice %33 {offsets = [0, 64], sizes = [8, 16], strides = [1, 1]} : vector<8x192xbf16> to vector<8x16xbf16>
    %c0_17 = arith.constant 0 : index
    %c0_18 = arith.constant 0 : index
    %c0_19 = arith.constant 0 : index
    %c0_20 = arith.constant 0 : index
    %39 = vector.load %arg7[%c0_17, %c0_18, %c0_19, %c0_20] : memref<1x4x8x16xbf16, #tpu.memory_space<vmem>>, vector<1x1x8x16xbf16>
    %40 = vector.shape_cast %39 : vector<1x1x8x16xbf16> to vector<8x16xbf16>
    %41 = vector.shape_cast %38 : vector<8x16xbf16> to vector<1x1x8x16xbf16>
    tpu.vector_store %arg7[%c0_17, %c0_18, %c0_19, %c0_20], %41 {strides = array<i32>} : memref<1x4x8x16xbf16, #tpu.memory_space<vmem>>, vector<1x1x8x16xbf16>,
    %42 = vector.extract_strided_slice %33 {offsets = [0, 128], sizes = [8, 16], strides = [1, 1]} : vector<8x192xbf16> to vector<8x16xbf16>
    %c0_21 = arith.constant 0 : index
    %c0_22 = arith.constant 0 : index
    %c0_23 = arith.constant 0 : index
    %c0_24 = arith.constant 0 : index
    %43 = vector.load %arg8[%c0_21, %c0_22, %c0_23, %c0_24] : memref<1x4x8x16xbf16, #tpu.memory_space<vmem>>, vector<1x1x8x16xbf16>
    %44 = vector.shape_cast %43 : vector<1x1x8x16xbf16> to vector<8x16xbf16>
    %45 = vector.shape_cast %42 : vector<8x16xbf16> to vector<1x1x8x16xbf16>
    tpu.vector_store %arg8[%c0_21, %c0_22, %c0_23, %c0_24], %45 {strides = array<i32>} : memref<1x4x8x16xbf16, #tpu.memory_space<vmem>>, vector<1x1x8x16xbf16>,
    %46 = vector.extract_strided_slice %33 {offsets = [0, 16], sizes = [8, 16], strides = [1, 1]} : vector<8x192xbf16> to vector<8x16xbf16>
    %c0_25 = arith.constant 0 : index
    %c1 = arith.constant 1 : index
    %c0_26 = arith.constant 0 : index
    %c0_27 = arith.constant 0 : index
    %47 = vector.load %arg6[%c0_25, %c1, %c0_26, %c0_27] : memref<1x4x8x16xbf16, #tpu.memory_space<vmem>>, vector<1x1x8x16xbf16>
    %48 = vector.shape_cast %47 : vector<1x1x8x16xbf16> to vector<8x16xbf16>
    %49 = vector.shape_cast %46 : vector<8x16xbf16> to vector<1x1x8x16xbf16>
    tpu.vector_store %arg6[%c0_25, %c1, %c0_26, %c0_27], %49 {strides = array<i32>} : memref<1x4x8x16xbf16, #tpu.memory_space<vmem>>, vector<1x1x8x16xbf16>,
    %50 = vector.extract_strided_slice %33 {offsets = [0, 80], sizes = [8, 16], strides = [1, 1]} : vector<8x192xbf16> to vector<8x16xbf16>
    %c0_28 = arith.constant 0 : index
    %c1_29 = arith.constant 1 : index
    %c0_30 = arith.constant 0 : index
    %c0_31 = arith.constant 0 : index
    %51 = vector.load %arg7[%c0_28, %c1_29, %c0_30, %c0_31] : memref<1x4x8x16xbf16, #tpu.memory_space<vmem>>, vector<1x1x8x16xbf16>
    %52 = vector.shape_cast %51 : vector<1x1x8x16xbf16> to vector<8x16xbf16>
    %53 = vector.shape_cast %50 : vector<8x16xbf16> to vector<1x1x8x16xbf16>
    tpu.vector_store %arg7[%c0_28, %c1_29, %c0_30, %c0_31], %53 {strides = array<i32>} : memref<1x4x8x16xbf16, #tpu.memory_space<vmem>>, vector<1x1x8x16xbf16>,
    %54 = vector.extract_strided_slice %33 {offsets = [0, 144], sizes = [8, 16], strides = [1, 1]} : vector<8x192xbf16> to vector<8x16xbf16>
    %c0_32 = arith.constant 0 : index
    %c1_33 = arith.constant 1 : index
    %c0_34 = arith.constant 0 : index
    %c0_35 = arith.constant 0 : index
    %55 = vector.load %arg8[%c0_32, %c1_33, %c0_34, %c0_35] : memref<1x4x8x16xbf16, #tpu.memory_space<vmem>>, vector<1x1x8x16xbf16>
    %56 = vector.shape_cast %55 : vector<1x1x8x16xbf16> to vector<8x16xbf16>
    %57 = vector.shape_cast %54 : vector<8x16xbf16> to vector<1x1x8x16xbf16>
    tpu.vector_store %arg8[%c0_32, %c1_33, %c0_34, %c0_35], %57 {strides = array<i32>} : memref<1x4x8x16xbf16, #tpu.memory_space<vmem>>, vector<1x1x8x16xbf16>,
    %58 = vector.extract_strided_slice %33 {offsets = [0, 32], sizes = [8, 16], strides = [1, 1]} : vector<8x192xbf16> to vector<8x16xbf16>
    %c0_36 = arith.constant 0 : index
    %c2 = arith.constant 2 : index
    %c0_37 = arith.constant 0 : index
    %c0_38 = arith.constant 0 : index
    %59 = vector.load %arg6[%c0_36, %c2, %c0_37, %c0_38] : memref<1x4x8x16xbf16, #tpu.memory_space<vmem>>, vector<1x1x8x16xbf16>
    %60 = vector.shape_cast %59 : vector<1x1x8x16xbf16> to vector<8x16xbf16>
    %61 = vector.shape_cast %58 : vector<8x16xbf16> to vector<1x1x8x16xbf16>
    tpu.vector_store %arg6[%c0_36, %c2, %c0_37, %c0_38], %61 {strides = array<i32>} : memref<1x4x8x16xbf16, #tpu.memory_space<vmem>>, vector<1x1x8x16xbf16>,
    %62 = vector.extract_strided_slice %33 {offsets = [0, 96], sizes = [8, 16], strides = [1, 1]} : vector<8x192xbf16> to vector<8x16xbf16>
    %c0_39 = arith.constant 0 : index
    %c2_40 = arith.constant 2 : index
    %c0_41 = arith.constant 0 : index
    %c0_42 = arith.constant 0 : index
    %63 = vector.load %arg7[%c0_39, %c2_40, %c0_41, %c0_42] : memref<1x4x8x16xbf16, #tpu.memory_space<vmem>>, vector<1x1x8x16xbf16>
    %64 = vector.shape_cast %63 : vector<1x1x8x16xbf16> to vector<8x16xbf16>
    %65 = vector.shape_cast %62 : vector<8x16xbf16> to vector<1x1x8x16xbf16>
    tpu.vector_store %arg7[%c0_39, %c2_40, %c0_41, %c0_42], %65 {strides = array<i32>} : memref<1x4x8x16xbf16, #tpu.memory_space<vmem>>, vector<1x1x8x16xbf16>,
    %66 = vector.extract_strided_slice %33 {offsets = [0, 160], sizes = [8, 16], strides = [1, 1]} : vector<8x192xbf16> to vector<8x16xbf16>
    %c0_43 = arith.constant 0 : index
    %c2_44 = arith.constant 2 : index
    %c0_45 = arith.constant 0 : index
    %c0_46 = arith.constant 0 : index
    %67 = vector.load %arg8[%c0_43, %c2_44, %c0_45, %c0_46] : memref<1x4x8x16xbf16, #tpu.memory_space<vmem>>, vector<1x1x8x16xbf16>
    %68 = vector.shape_cast %67 : vector<1x1x8x16xbf16> to vector<8x16xbf16>
    %69 = vector.shape_cast %66 : vector<8x16xbf16> to vector<1x1x8x16xbf16>
    tpu.vector_store %arg8[%c0_43, %c2_44, %c0_45, %c0_46], %69 {strides = array<i32>} : memref<1x4x8x16xbf16, #tpu.memory_space<vmem>>, vector<1x1x8x16xbf16>,
    %70 = vector.extract_strided_slice %33 {offsets = [0, 48], sizes = [8, 16], strides = [1, 1]} : vector<8x192xbf16> to vector<8x16xbf16>
    %c0_47 = arith.constant 0 : index
    %c3 = arith.constant 3 : index
    %c0_48 = arith.constant 0 : index
    %c0_49 = arith.constant 0 : index
    %71 = vector.load %arg6[%c0_47, %c3, %c0_48, %c0_49] : memref<1x4x8x16xbf16, #tpu.memory_space<vmem>>, vector<1x1x8x16xbf16>
    %72 = vector.shape_cast %71 : vector<1x1x8x16xbf16> to vector<8x16xbf16>
    %73 = vector.shape_cast %70 : vector<8x16xbf16> to vector<1x1x8x16xbf16>
    tpu.vector_store %arg6[%c0_47, %c3, %c0_48, %c0_49], %73 {strides = array<i32>} : memref<1x4x8x16xbf16, #tpu.memory_space<vmem>>, vector<1x1x8x16xbf16>,
    %74 = vector.extract_strided_slice %33 {offsets = [0, 112], sizes = [8, 16], strides = [1, 1]} : vector<8x192xbf16> to vector<8x16xbf16>
    %c0_50 = arith.constant 0 : index
    %c3_51 = arith.constant 3 : index
    %c0_52 = arith.constant 0 : index
    %c0_53 = arith.constant 0 : index
    %75 = vector.load %arg7[%c0_50, %c3_51, %c0_52, %c0_53] : memref<1x4x8x16xbf16, #tpu.memory_space<vmem>>, vector<1x1x8x16xbf16>
    %76 = vector.shape_cast %75 : vector<1x1x8x16xbf16> to vector<8x16xbf16>
    %77 = vector.shape_cast %74 : vector<8x16xbf16> to vector<1x1x8x16xbf16>
    tpu.vector_store %arg7[%c0_50, %c3_51, %c0_52, %c0_53], %77 {strides = array<i32>} : memref<1x4x8x16xbf16, #tpu.memory_space<vmem>>, vector<1x1x8x16xbf16>,
    %78 = vector.extract_strided_slice %33 {offsets = [0, 176], sizes = [8, 16], strides = [1, 1]} : vector<8x192xbf16> to vector<8x16xbf16>
    %c0_54 = arith.constant 0 : index
    %c3_55 = arith.constant 3 : index
    %c0_56 = arith.constant 0 : index
    %c0_57 = arith.constant 0 : index
    %79 = vector.load %arg8[%c0_54, %c3_55, %c0_56, %c0_57] : memref<1x4x8x16xbf16, #tpu.memory_space<vmem>>, vector<1x1x8x16xbf16>
    %80 = vector.shape_cast %79 : vector<1x1x8x16xbf16> to vector<8x16xbf16>
    %81 = vector.shape_cast %78 : vector<8x16xbf16> to vector<1x1x8x16xbf16>
    tpu.vector_store %arg8[%c0_54, %c3_55, %c0_56, %c0_57], %81 {strides = array<i32>} : memref<1x4x8x16xbf16, #tpu.memory_space<vmem>>, vector<1x1x8x16xbf16>,
    return
  }
  func.func @transform_0(%arg0: i32, %arg1: i32) -> (i32, i32, i32) {
    %c0_i32 = arith.constant 0 : i32
    %c0_i32_0 = arith.constant 0 : i32
    return %arg0, %arg1, %c0_i32 : i32, i32, i32
  }
  func.func @transform_1(%arg0: i32, %arg1: i32) -> (i32, i32) {
    %c0_i32 = arith.constant 0 : i32
    %c0_i32_0 = arith.constant 0 : i32
    %c0_i32_1 = arith.constant 0 : i32
    return %c0_i32, %c0_i32_0 : i32, i32
  }
  func.func @transform_2(%arg0: i32, %arg1: i32) -> (i32, i32) {
    %c0_i32 = arith.constant 0 : i32
    %c0_i32_0 = arith.constant 0 : i32
    %c0_i32_1 = arith.constant 0 : i32
    return %c0_i32, %c0_i32_0 : i32, i32
  }
  func.func @transform_3(%arg0: i32, %arg1: i32) -> (i32, i32) {
    %c0_i32 = arith.constant 0 : i32
    %c0_i32_0 = arith.constant 0 : i32
    %c0_i32_1 = arith.constant 0 : i32
    return %c0_i32, %c0_i32_0 : i32, i32
  }
  func.func @transform_4(%arg0: i32, %arg1: i32) -> (i32, i32, i32, i32) {
    %c0_i32 = arith.constant 0 : i32
    %c0_i32_0 = arith.constant 0 : i32
    %c0_i32_1 = arith.constant 0 : i32
    return %arg0, %c0_i32, %arg1, %c0_i32_0 : i32, i32, i32, i32
  }
  func.func @transform_5(%arg0: i32, %arg1: i32) -> (i32, i32, i32, i32) {
    %c0_i32 = arith.constant 0 : i32
    %c0_i32_0 = arith.constant 0 : i32
    %c0_i32_1 = arith.constant 0 : i32
    return %arg0, %c0_i32, %arg1, %c0_i32_0 : i32, i32, i32, i32
  }
  func.func @transform_6(%arg0: i32, %arg1: i32) -> (i32, i32, i32, i32) {
    %c0_i32 = arith.constant 0 : i32
    %c0_i32_0 = arith.constant 0 : i32
    %c0_i32_1 = arith.constant 0 : i32
    return %arg0, %c0_i32, %arg1, %c0_i32_0 : i32, i32, i32, i32
  }
}

</mosaic_0001>

<bundles_post_ra>
// kernel: tpu_custom_call.1
= control target key start
LH: loop header
LB: loop body
LE: loop exit
PB: predicated region body
PF: predicated region fallthrough
CT: control target
= control target key end

     0   :  { %s1391_s0 = inlined_call_operand.hbm [shape: f32[2,8,32], index: 0, kind: input, shape index: {}]   ;;  %s1392_s1 = inlined_call_operand.vmem [shape: f32[1,32], index: 1, kind: input, shape index: {}]   ;;  %s1393_s2 = inlined_call_operand.vmem [shape: f32[1,32], index: 2, kind: input, shape index: {}]   ;;  %s1394_s3 = inlined_call_operand.hbm [shape: bf16[32,192], index: 3, kind: input, shape index: {}]   ;;  %s1395_s4 = inlined_call_operand.hbm [shape: bf16[2,4,8,16], index: 4, kind: output, shape index: {0}]   ;;  %s1396_s5 = inlined_call_operand.hbm [shape: bf16[2,4,8,16], index: 5, kind: output, shape index: {1}]   ;;  %s1397_s6 = inlined_call_operand.hbm [shape: bf16[2,4,8,16], index: 6, kind: output, shape index: {2}]  }
   0x1   :  { %1402 = sst [smem:[#allocation17_spill]] %s1394_s3 }
   0x2   :  { %12 = vsyncpa [#allocation3], 0 }
   0x3   :  { %14 = vsyncpa [#allocation3 + $0x1], 0 }
   0x4   :  { %15 = vsyncpa [#allocation6], 0 }
   0x5   :  { %16 = vsyncpa [#allocation4], 0 }
   0x6   :  { %18 = vsyncpa [#allocation4 + $0x1], 0 }
   0x7   :  { %19 = vsyncpa [#allocation9], 0 }
   0x8   :  { %21 = vsyncpa [#allocation9 + $0x1], 0  ;;  %s1097_s21 = smov 0   ;;  %s1099_s22 = smov 0  }
   0x9   :  { %s1101_s23 = smov 0   ;;  %s1103_s24 = smov 0  }
   0xa   :  { %s1105_s25 = smov 0   ;;  %s1107_s26 = smov 0  }
   0xb LB: > { %1403 = sst [smem:[#allocation15_spill]] %s1040_s25  ;;  %s1128_s27 = sadd.s32 4294967295, %s1044_s26   ;;  %s1044_s26 = sphi %s1107_s26, %s27_s26   ;;  %s1040_s25 = sphi %s1105_s25, %s1420_s25   ;;  %s1036_s24 = sphi %s1103_s24, %s1419_s24   ;;  %s1032_s23 = sphi %s1101_s23, %s1423_s23   ;;  %s1028_s22 = sphi %s1099_s22, %s1422_s22   ;;  %s1024_s21 = sphi %s1097_s21, %s1421_s21  }
   0xc   : > { %s1398_s28 = sadd.s32 4294967294, %s1044_s26   ;;  %p61_p0 = scmp.ne.s32.totalorder %s1028_s22, %s1024_s21 }
   0xd   : > { %p1401_p1 = scmp.eq.s32.totalorder %s1128_s27, 0  ;;  %p156_p3 = scmp.eq.s32.totalorder %s1398_s28, 1 }
   0xe   : > { %p703_p5 = scmp.ge.s32.totalorder %s1044_s26, 1  ;;  %p219_p7 = scmp.lt.s32.totalorder %s1044_s26, 3 }
   0xf   : > { %p1139_p4 = por %p1401_p1, %p61_p0  ;;  %p1144_p6 = por %p156_p3, %p61_p0 }
  0x10   : > { %p1149_p8 = pnand %p703_p5, %p219_p7  ;;  %s1046_s8 = smov [#allocation5]  }
  0x11   : > { %s1405_s30 = scalar_select %p1144_p6, 1, 0 }
  0x12   : > { %s237_s9 = sshll.u32 %s1046_s8, 4  ;;  %p760_p9 = pneg %p1149_p8  ;;  %s238_s9 = int_to_ptr.vmem [resolvable:$true] %s237_s9 }
  0x13   : > { %s39_s11 = sadd.s32 1, %s1040_s25  ;;  %s861_s12 = scalar_lea.vmem %s238_s9, 512 }
  0x14   : > { %p1158_p11 = pnand %p760_p9, %p1401_p1  ;;  %p862_p13 = scmp.ne.s32.totalorder %s238_s9, %s861_s12 }
  0x15   : > { %p869_p5 = scmp.lt.s32.totalorder %s238_s9, %s238_s9  ;;  %p870_p7 = scmp.lt.s32.totalorder %s861_s12, %s861_s12 }
  0x16   : > { %p852_p12 = pneg %p1158_p11 }
  0x17   : > { %p871_p2 = por %p870_p7, %p869_p5 }
  0x18   : > { %p864_p0 = pnand %p862_p13, %p852_p12 }
  0x1a   : > { %p865_p3 = pneg %p864_p0 }
  0x1c   : > { %p872_p6 = pnand %p871_p2, %p865_p3 }
  0x1e   : > { %875 = shalt.err (!%p872_p6)
}
  0x1f   : > { %s1047_s13 = smov 128   ;;  %s1048_s14 = smov 8  }
  0x20   : > { %s1408_s3 = sld [smem:[#allocation17_spill]]  ;;  %p41_p2 = scmp.ge.s32.totalorder %s39_s11, 2 }
  0x21   : > { %s48_s17 = sadd.s32 1, %s1032_s23  ;;  %p55_p6 = scmp.ne.s32.totalorder %s1032_s23, %s1028_s22 }
  0x22   : > { %p56_p9 = scmp.eq.s32.totalorder %s1044_s26, 0  ;;  %s1425_s11 = smov (%p41_p2, %s39_s11), 0 }
  0x23   : > { %1409 = sst [smem:[#allocation16_spill]] %s1425_s11  ;;  %p1411_p13 = scmp.eq.s32.totalorder %s1128_s27, 1 }
  0x24   : > { %p1176_p12 = por %p56_p9, %p55_p6  ;;  %s43_s20 = ssub.s32 %s1040_s25, %s1425_s11 }
  0x25   : > { %p1182_p0 = por %p1411_p13, %p55_p6  ;;  %p779_p3 = scmp.lt.s32.totalorder %s1044_s26, 2 }
  0x26   : > { %763 = dma.hbm_to_vmem [thread:$0]  (!%p1158_p11), %s1408_s3, 512, %s238_s9, [#allocation6], %s1047_s13, %s1047_s13, %s1048_s14  }
  0x27   : > { %p46_p11 = scmp.eq.s32.totalorder %s43_s20, 0  ;;  %s251_s8 = sand.u32 1, %s1032_s23  }
  0x28   : > { %s706_s9 = sshll.u32 %s251_s8, 3  ;;  %s707_s12 = sshll.u32 %s1040_s25, 7 }
  0x29   : > { %s1191_s10 = scalar_select %p46_p11, %s1032_s23, %s48_s17  }
  0x2a   : > { %s261_s15 = scalar_lea.hbm %s1391_s0, %s707_s12  ;;  %s255_s16 = scalar_lea.vmem [#allocation2], %s706_s9 }
  0x2b   : > { %s263_s28 = sshll.u32 %s255_s16, 4  ;;  %p1199_p5 = pnand %p779_p3, %p1176_p12  ;;  %s264_s28 = int_to_ptr.vmem [resolvable:$true] %s263_s28 }
  0x2c   : > { %s252_s11 = scalar_lea.sflag [#allocation3], %s251_s8  ;;  %s889_s20 = scalar_lea.vmem %s264_s28, 128 }
  0x2d   : > { %p878_p7 = pneg %p1199_p5  ;;  %p890_p2 = scmp.ne.s32.totalorder %s264_s28, %s889_s20 }
  0x2e   : > { %s1049_s17 = smov [#allocation2]  }
  0x2f   : > { %p892_p6 = pnand %p890_p2, %p878_p7  ;;  %s894_s25 = sshll.u32 %s1049_s17, 4  ;;  %s895_s25 = int_to_ptr.vmem [resolvable:$false] %s894_s25 }
  0x30   : > { %s896_s12 = scalar_lea.vmem %s895_s25, 256  ;;  %p897_p13 = scmp.lt.s32.totalorder %s264_s28, %s895_s25 }
  0x31   : > { %p893_p9 = pneg %p892_p6  ;;  %p898_p11 = scmp.lt.s32.totalorder %s896_s12, %s889_s20 }
  0x33   : > { %p899_p10 = por %p898_p11, %p897_p13 }
  0x35   : > { %p900_p1 = pnand %p899_p10, %p893_p9 }
  0x37   : > { %903 = shalt.err (!%p900_p1)
}
  0x38   : > { %767 = dma.hbm_to_vmem [thread:$0]  (!%p1199_p5), %s261_s15, 128, %s264_s28, %s252_s11  }
  0x39   : > { %272 = sbr.rel (%p1149_p8) target bundleno = 755 (0x2f3), region = 36  ;;  %s1210_s18 = sand.u32 (!%p1149_p8), 1, %s1028_s22  }
  0x3a   : > { %s709_s8 = sshll.u32 (!%p1149_p8), %s1210_s18, 3  ;;  %s275_s9 = scalar_lea.sflag (!%p1149_p8), [#allocation3], %s1210_s18 }
  0x3b   : > { %s278_s13 = scalar_lea.vmem (!%p1149_p8), [#allocation2], %s709_s8 }
  0x3e   : > { %1007 = dma.done.wait (%p1139_p4), %s275_s9, 128  }
  0x3f   : > { %1009 = vsyncadd (%p1139_p4), %s275_s9, 4294967168  ;;  %p1414_p1 = scmp.eq.s32.totalorder %s1128_s27, 0 }
  0x41   : > { %1011 = dma.done.wait (%p1414_p1), [#allocation6], 512   ;;  %p1415_p10 = pmov %p1414_p1 }
  0x42   : > { %vm323_vm0 = vcmask 261120   ;;  %v322_v0 = vld [vmem:[%s278_s13] sm:$0xff]  ;;  %v845_v9 = vld [vmem:[#allocation5 + $0x4] ss:$8 sps:$4 sm:$0xff]   ;;  %v1050_v10 = vmov 0   ;;  %s1232_s7 = sshll.u32 %s1210_s18, 4 }
  0x43   : > { %1013 = vsyncadd (%p1415_p10), [#allocation6], 4294966784  ;;  %v324_v1 = vsel %vm323_vm0, %v322_v0, 0.0  ;;  %v842_v7 = vld [vmem:[#allocation5 + $0x14] ss:$8 sps:$4 sm:$0xff]   ;;  %414 = vmatprep.mubr.bf16.mxu0 %v1050_v10  ;;  %vm425_vm1 = vcmask 125952  }
  0x44   : > { %325 = vadd.xlane.f32.xlu0 %v324_v1  ;;  %v844_v8 = vld [vmem:[#allocation5 + $0x10] ss:$8 sps:$4 sm:$0xff]   ;;  %394 = vmatprep.subr.bf16.mxu0 %v842_v7  ;;  %v847_v11 = vld [vmem:[#allocation5] ss:$8 sps:$4 sm:$0xff]   ;;  %s1051_s11 = smov 32   ;;  %s1052_s14 = smov 64  }
  0x45   : > { %395 = vmatpush1.bf16.msra.mxu0 %v844_v8  ;;  %v714_v16 = vld [vmem:[%s1392_s1] ss:$0 sm:$0xff]  ;;  %s1236_s15 = scalar_lea.vmem [#allocation7], %s1232_s7  ;;  %s1241_s16 = scalar_lea.vmem [#allocation10], %s1232_s7 }
  0x46   : > { %396 = vmatprep.subr.bf16.mxu0 %v845_v9  ;;  %v715_v18 = vld [vmem:[%s1393_s2] ss:$0 sm:$0xff]  ;;  %s1053_s20 = smov 48   ;;  %s1054_s17 = smov 80  }
  0x47   : > { %s1055_s12 = smov 16   ;;  %s1056_s8 = smov 112  }
  0x48   : > { %s1057_s9 = smov 96   ;;  %s313_s13 = scalar_lea.vmem [#allocation8], %s1232_s7 }
  0x49   : > { %397 = vmatpush1.bf16.msra.mxu0 %v847_v11  ;;  %s525_s3 = sshll.u32 %s313_s13, 4  ;;  %s488_s25 = sand.u32 1, %s1128_s27   ;;  %s1255_s3 = int_to_ptr.vmem [resolvable:$true] %s525_s3 }
  0x4a   : > { %s1250_s28 = sshll.u32 %s1036_s24, 8  ;;  %s1264_s24 = scalar_lea.sflag [#allocation9], %s488_s25 }
  0x4b   : > { %s904_s27 = scalar_lea.vmem %s1255_s3, 256 }
  0x4c   : > { %p905_p4 = scmp.ne.s32.totalorder %s1255_s3, %s904_s27 }
  0x4e   : > { %p906_p8 = pnand %p905_p4, %p1182_p0 }
  0x50   : > { %p907_p12 = pneg %p906_p8 }
  0xcd   : > { %v326_v2 = vpop.xlane.xlu0 %325 }
  0xce   : > { %v328_v3 = vmul.f32 0.03125, %v326_v2 }
  0xd0   : > { %v329_v4 = vsub.f32 %v322_v0, %v328_v3 }
  0xd2   : > { %v330_v5 = vmul.f32 %v329_v4, %v329_v4 }
  0xd4   : > { %v331_v6 = vsel %vm323_vm0, %v330_v5, 0.0 }
  0xd5   : > { %332 = vadd.xlane.f32.xlu0 %v331_v6 }
 0x15e   : > { %v333_v12 = vpop.xlane.xlu0 %332 }
 0x15f   : > { %v334_v13 = vmul.f32 0.03125, %v333_v12 }
 0x161   : > { %v335_v14 = vadd.f32 1e-05, %v334_v13 }
 0x163   : > { %848 = vrsqrt.f32 %v335_v14 }
 0x170   : > { %v849_v15 = vpop.eup %848 }
 0x171   : > { %v337_v17 = vmul.f32 %v849_v15, %v329_v4 }
 0x173   : > { %v345_v19 = vmul.f32 %v714_v16, %v337_v17 }
 0x175   : > { %v353_v20 = vadd.f32 %v715_v18, %v345_v19 }
 0x177   : > { %v354_v21 = vpack.c.bf16 %v353_v20, %v353_v20 }
 0x179   : > { %720 = vmatmul.mubr.msk.bf16.vlgmr.msra.gmra.mxu0 %vm323_vm0, %v354_v21 }
 0x239   : > { %v416_v22 = vpop.f32.mrf.mxu0 }
 0x23a   : > { %v423_v23 = vpack.c.bf16 %v416_v22, %v416_v22 }
 0x23b   : > { %v418_v24 = vpop.f32.mrf.mxu0 }
 0x23c   : > { %v424_v25 = vpack.c.bf16 %v418_v24, %v418_v24  ;;  %458 = vrot.lane.b32.xlu0 %v423_v23, %s1051_s11  ;;  %430 = vrot.lane.b32.xlu1 %v423_v23, %s1052_s14  ;;  %426 = vst.msk [vmem:[%s1236_s15] sm:$0xf] %vm425_vm1, %v423_v23  ;;  %s1261_s11 = scalar_lea.hbm %s1396_s5, %s1250_s28 }
 0x23d   : > { %v420_v26 = vpop.f32.mrf.mxu0 }
 0x23e   : > { %434 = vst.msk [vmem:[%s1241_s16] sm:$0xf] %vm425_vm1, %v424_v25 }
 0x23f   : > { %v421_v27 = vpop.f32.mrf.mxu0 }
 0x240   : > { %440 = vrot.lane.b32.xlu1 %v423_v23, %s1053_s20  ;;  %478 = vrot.lane.b32.xlu0 %v424_v25, %s1054_s17  ;;  %s1058_s20 = smov [#allocation8]  }
 0x244   : > { %473 = vrot.lane.b32.xlu1 %v423_v23, %s1055_s12 }
 0x248   : > { %435 = vrot.lane.b32.xlu1 %v423_v23, %s1056_s8 }
 0x24c   : > { %453 = vrot.lane.b32.xlu1 %v423_v23, %s1057_s9 }
 0x250   : > { %448 = vrot.lane.b32.xlu1 %v424_v25, %s1056_s8 }
 0x254   : > { %463 = vrot.lane.b32.xlu1 %v424_v25, %s1057_s9 }
 0x258   : > { %468 = vrot.lane.b32.xlu1 %v423_v23, %s1054_s17  ;;  %s908_s17 = sshll.u32 %s1058_s20, 4  ;;  %s909_s17 = int_to_ptr.vmem [resolvable:$false] %s908_s17 }
 0x259   : > { %s910_s12 = scalar_lea.vmem %s909_s17, 512  ;;  %p911_p3 = scmp.lt.s32.totalorder %s1255_s3, %s909_s17 }
 0x25a   : > { %p912_p5 = scmp.lt.s32.totalorder %s910_s12, %s904_s27 }
 0x25c   : > { %p913_p7 = por %p912_p5, %p911_p3 }
 0x25e   : > { %p914_p2 = pnand %p913_p7, %p907_p12 }
 0x2ae   : > { %v459_v28 = vpop.permute.xlu0 %458  ;;  %v431_v29 = vpop.permute.xlu1 %430 }
 0x2af   : > { %727 = vst.msk [vmem:[%s313_s13 + $0x8] sm:$0xf] %vm425_vm1, %v459_v28  ;;  %433 = vst.msk [vmem:[%s313_s13] sm:$0xf] %vm425_vm1, %v431_v29 }
 0x2b2   : > { %v441_v30 = vpop.permute.xlu1 %440  ;;  %v479_v31 = vpop.permute.xlu0 %478 }
 0x2b3   : > { %723 = vst.msk [vmem:[%s313_s13 + $0x4] sm:$0xf] %vm425_vm1, %v441_v30  ;;  %731 = vst.msk [vmem:[%s1241_s16 + $0xc] sm:$0xf] %vm425_vm1, %v479_v31 }
 0x2b6   : > { %v474_v32 = vpop.permute.xlu1 %473 }
 0x2b7   : > { %730 = vst.msk [vmem:[%s313_s13 + $0xc] sm:$0xf] %vm425_vm1, %v474_v32 }
 0x2b8   : > { %917 = shalt.err (!%p914_p2)
}
 0x2b9   : > { %s918_s8 = scalar_lea.hbm %s1261_s11, 256  ;;  %s922_s25 = scalar_lea.hbm %s1396_s5, 512 }
 0x2ba   : > { %p919_p6 = scmp.ne.s32.totalorder %s1261_s11, %s918_s8  ;;  %p923_p11 = scmp.lt.s32.totalorder %s1261_s11, %s1396_s5 }
 0x2bb   : > { %p924_p1 = scmp.lt.s32.totalorder %s922_s25, %s918_s8 }
 0x2bc   : > { %p920_p9 = pnand %p919_p6, %p1182_p0 }
 0x2bd   : > { %p925_p10 = por %p924_p1, %p923_p11 }
 0x2be   : > { %p921_p13 = pneg %p920_p9 }
 0x2c0   : > { %p926_p4 = pnand %p925_p10, %p921_p13 }
 0x2c2   : > { %929 = shalt.err (!%p926_p4)
}
 0x2c3   : > { %s1059_s27 = smov 4   ;;  %v436_v33 = vpop.permute.xlu1 %435  ;;  %s542_s20 = sshll.u32 %s1241_s16, 4  ;;  %s1298_s20 = int_to_ptr.vmem [resolvable:$true] %s542_s20 }
 0x2c4   : > { %755 = dma.vmem_to_hbm [thread:$0]  (%p1182_p0), %s1255_s3, 256, %s1261_s11, %s1264_s24, %s1052_s14, %s1052_s14, %s1059_s27  }
 0x2c5   : > { %722 = vst.msk [vmem:[%s1236_s15 + $0x4] sm:$0xf] %vm425_vm1, %v436_v33  ;;  %s508_s17 = sshll.u32 %s1236_s15, 4  ;;  %s1304_s3 = scalar_lea.hbm %s1397_s6, %s1250_s28  ;;  %s1306_s17 = int_to_ptr.vmem [resolvable:$true] %s508_s17 }
 0x2c6   : > { %s930_s11 = scalar_lea.vmem %s1298_s20, 256  ;;  %s1060_s9 = smov [#allocation10]  }
 0x2c7   : > { %v454_v34 = vpop.permute.xlu1 %453  ;;  %p931_p8 = scmp.ne.s32.totalorder %s1298_s20, %s930_s11  ;;  %s934_s13 = sshll.u32 %s1060_s9, 4  ;;  %s935_s13 = int_to_ptr.vmem [resolvable:$false] %s934_s13 }
 0x2c8   : > { %726 = vst.msk [vmem:[%s1236_s15 + $0x8] sm:$0xf] %vm425_vm1, %v454_v34  ;;  %s936_s25 = scalar_lea.vmem %s935_s13, 512  ;;  %p937_p5 = scmp.lt.s32.totalorder %s1298_s20, %s935_s13 }
 0x2c9   : > { %p932_p12 = pnand %p931_p8, %p1182_p0  ;;  %p938_p7 = scmp.lt.s32.totalorder %s936_s25, %s930_s11 }
 0x2cb   : > { %v449_v35 = vpop.permute.xlu1 %448  ;;  %p933_p3 = pneg %p932_p12  ;;  %p939_p2 = por %p938_p7, %p937_p5 }
 0x2cc   : > { %725 = vst.msk [vmem:[%s1241_s16 + $0x4] sm:$0xf] %vm425_vm1, %v449_v35 }
 0x2cd   : > { %p940_p6 = pnand %p939_p2, %p933_p3 }
 0x2cf   : > { %v464_v36 = vpop.permute.xlu1 %463 }
 0x2d0   : > { %728 = vst.msk [vmem:[%s1241_s16 + $0x8] sm:$0xf] %vm425_vm1, %v464_v36 }
 0x2d1   : > { %943 = shalt.err (!%p940_p6)
}
 0x2d2   : > { %s944_s29 = scalar_lea.hbm %s1304_s3, 256  ;;  %s948_s12 = scalar_lea.hbm %s1397_s6, 512 }
 0x2d3   : > { %p945_p9 = scmp.ne.s32.totalorder %s1304_s3, %s944_s29  ;;  %p949_p1 = scmp.lt.s32.totalorder %s1304_s3, %s1397_s6 }
 0x2d4   : > { %p950_p10 = scmp.lt.s32.totalorder %s948_s12, %s944_s29 }
 0x2d5   : > { %p946_p13 = pnand %p945_p9, %p1182_p0 }
 0x2d6   : > { %p951_p4 = por %p950_p10, %p949_p1 }
 0x2d7   : > { %p947_p11 = pneg %p946_p13 }
 0x2d9   : > { %p952_p8 = pnand %p951_p4, %p947_p11 }
 0x2db   : > { %955 = shalt.err (!%p952_p8)
}
 0x2dc   : > { %756 = dma.vmem_to_hbm [thread:$0]  (%p1182_p0), %s1298_s20, 256, %s1304_s3, %s1264_s24, %s1052_s14, %s1052_s14, %s1059_s27   ;;  %v469_v37 = vpop.permute.xlu1 %468 }
 0x2dd   : > { %s1338_s25 = scalar_lea.hbm %s1395_s4, %s1250_s28  ;;  %729 = vst.msk [vmem:[%s1236_s15 + $0xc] sm:$0xf] %vm425_vm1, %v469_v37  ;;  %s484_s29 = scalar_lea.sflag [#allocation4], %s1210_s18 }
 0x2de   : > { %s956_s16 = scalar_lea.vmem %s1306_s17, 256  ;;  %s1061_s7 = smov [#allocation7]  }
 0x2df   : > { %p957_p12 = scmp.ne.s32.totalorder %s1306_s17, %s956_s16  ;;  %s960_s12 = sshll.u32 %s1061_s7, 4  ;;  %s961_s12 = int_to_ptr.vmem [resolvable:$false] %s960_s12 }
 0x2e0   : > { %s962_s8 = scalar_lea.vmem %s961_s12, 512  ;;  %p963_p7 = scmp.lt.s32.totalorder %s1306_s17, %s961_s12 }
 0x2e1   : > { %p958_p3 = pnand %p957_p12, %p1182_p0  ;;  %p964_p2 = scmp.lt.s32.totalorder %s962_s8, %s956_s16 }
 0x2e3   : > { %p959_p5 = pneg %p958_p3  ;;  %p965_p6 = por %p964_p2, %p963_p7 }
 0x2e5   : > { %p966_p9 = pnand %p965_p6, %p959_p5 }
 0x2e7   : > { %969 = shalt.err (!%p966_p9)
}
 0x2e8   : > { %s970_s15 = scalar_lea.hbm %s1338_s25, 256  ;;  %s974_s24 = scalar_lea.hbm %s1395_s4, 512 }
 0x2e9   : > { %p971_p13 = scmp.ne.s32.totalorder %s1338_s25, %s970_s15  ;;  %p975_p10 = scmp.lt.s32.totalorder %s1338_s25, %s1395_s4 }
 0x2ea   : > { %p976_p4 = scmp.lt.s32.totalorder %s974_s24, %s970_s15 }
 0x2eb   : > { %p972_p11 = pnand %p971_p13, %p1182_p0 }
 0x2ec   : > { %p977_p8 = por %p976_p4, %p975_p10 }
 0x2ed   : > { %p973_p1 = pneg %p972_p11 }
 0x2ef   : > { %p978_p12 = pnand %p977_p8, %p973_p1 }
 0x2f1   : > { %981 = shalt.err (!%p978_p12)
}
 0x2f2   : > { %754 = dma.vmem_to_hbm [thread:$0]  (%p1182_p0), %s1306_s17, 256, %s1338_s25, %s484_s29, %s1052_s14, %s1052_s14, %s1059_s27  }
 0x2f3 PF: > { %s557_s9 = sand.u32 1, %s1024_s21   ;;  %p1416_p3 = scmp.ne.s32.totalorder %s1405_s30, 0 }
 0x2f4   : > { %p1417_p5 = scmp.ge.s32.totalorder %s1044_s26, 2  ;;  %s558_s11 = scalar_lea.sflag [#allocation4], %s557_s9 }
 0x2f6   : > { %p769_p7 = pnand %p1417_p5, %p1416_p3 }
 0x2f8   : > { %p770_p2 = pneg %p769_p7 }
 0x2fa   : > { %1015 = dma.done.wait (%p770_p2), %s558_s11, 256  }
 0x2fb   : > { %1017 = vsyncadd (%p770_p2), %s558_s11, 4294967040  ;;  %s1418_s19 = sadd.s32 4294967294, %s1044_s26  }
 0x2fc   : > { %s566_s13 = sand.u32 1, %s1418_s19  }
 0x2fd   : > { %s567_s16 = scalar_lea.sflag [#allocation9], %s566_s13 }
 0x2fe   : > { %1019 = dma.done.wait (%p770_p2), %s567_s16, 512  }
 0x2ff   : > { %1021 = vsyncadd (%p770_p2), %s567_s16, 4294966784  ;;  %s27_s26 = sadd.s32 1, %s1044_s26   ;;  %s1419_s24 = sld [smem:[#allocation15_spill]] }
 0x300   : > { %p24_p0 = scmp.ge.s32.totalorder %s27_s26, 4   ;;  %s1420_s25 = sld [smem:[#allocation16_spill]] }
 0x301   : > { %s1421_s21 = smov %s1028_s22  ;;  %s1422_s22 = smov %s1032_s23 }
 0x302   : > { %s1423_s23 = smov %s1191_s10  ;;  %26 = sbr.rel (!%p24_p0) target bundleno = 11 (0xb), region = 126 }
 0x307   :  { %581 = vsyncpa [#allocation3], 1 }
 0x308   :  { %583 = vsyncpa [#allocation3 + $0x1], 1 }
 0x309   :  { %584 = vsyncpa [#allocation6], 1 }
 0x30a   :  { %585 = vsyncpa [#allocation4], 1 }
 0x30b   :  { %587 = vsyncpa [#allocation4 + $0x1], 1 }
 0x30c   :  { %588 = vsyncpa [#allocation9], 1 }
 0x30d   :  { %590 = vsyncpa [#allocation9 + $0x1], 1 }

</bundles_post_ra>
